<compile_context>
chip_gen: v7x
topology: tpu7x:2x2x1
jax: 0.10.0
libtpu: 0.0.40
codegen_flags: <defaults>
</compile_context>

<pallas_src>
import functools
import math

import jax
import jax.numpy as jnp
from jax.experimental import pallas as pl
from jax.experimental.pallas import tpu as pltpu  # noqa: F401  (kept for TPU-specific extensions)


# ---------------------------------------------------------------------------
# Pallas kernel: one fused bidirectional LSTM layer
# ---------------------------------------------------------------------------
def _bilstm_layer_kernel(x2_ref, win_ref, bin_ref, whh_ref, mask_ref, out_ref,
                         *, seq_len, batch, hidden):
    """Both directions of one LSTM layer, time loop inside, all data in VMEM.

      x2_ref   : (T*B, 2*D)  row t*B+b = [x[t, b, :], x[T-1-t, b, :]]
      win_ref  : (2*D, 8H)   fused input weights (gate-major, dir-minor cols)
      bin_ref  : (1, 8H)     fused bias (b_ih + b_hh), same column layout
      whh_ref  : (2H, 8H)    block recurrent weights (rows = [h_fwd | h_bwd])
      mask_ref : (T, B, 2H)  validity: [:, :, :H] for fwd time s,
                             [:, :, H:] for bwd time T-1-s
      out_ref  : (T, B, 2H)  layer output, [:, :, :H] = fwd, [:, :, H:] = bwd
    """
    T, B, H = seq_len, batch, hidden
    H2 = 2 * H

    # Hoisted input projection: ONE MXU matmul covering every timestep and both
    # directions (time-parallel work taken off the serial critical path).
    xp = (jnp.dot(x2_ref[...], win_ref[...],
                  preferred_element_type=jnp.float32)
          + bin_ref[...])                                  # (T*B, 8H)

    whh = whh_ref[...]                                     # (2H, 8H)
    mask = mask_ref[...]                                   # (T, B, 2H)

    h2 = jnp.zeros((B, H2), jnp.float32)                   # [h_fwd | h_bwd]
    c2 = jnp.zeros((B, H2), jnp.float32)

    # Serial recurrence: per step only the small (B,2H)@(2H,8H) matmul plus
    # lane-packed elementwise gates.  Fully unrolled (T small & static).
    for s in range(T):
        gates = xp[s * B:(s + 1) * B, :] + jnp.dot(
            h2, whh, preferred_element_type=jnp.float32)   # (B, 8H) = 128 lanes
        # gate-major, dir-minor layout -> 4 contiguous 2H-wide slices
        i2 = jax.nn.sigmoid(gates[:, 0:H2])
        f2 = jax.nn.sigmoid(gates[:, H2:2 * H2])
        g2 = jnp.tanh(gates[:, 2 * H2:3 * H2])
        o2 = jax.nn.sigmoid(gates[:, 3 * H2:4 * H2])
        c2 = f2 * c2 + i2 * g2
        h2 = o2 * jnp.tanh(c2)
        m = mask[s]                                        # (B, 2H)
        h2 = h2 * m        # packed-sequence emulation: zero state past length
        c2 = c2 * m
        out_ref[s, :, 0:H] = h2[:, 0:H]                    # fwd output @ time s
        out_ref[T - 1 - s, :, H:H2] = h2[:, H:H2]          # bwd output @ time T-1-s


# ---------------------------------------------------------------------------
# Fused weight / input packing helpers (trace-time, tiny)
# ---------------------------------------------------------------------------
def _interleave_gates(a, b, H):
    """(.., 4H) x2 -> (.., 8H): per gate q, block [a_gate_q (H) | b_gate_q (H)]."""
    parts = []
    for q in range(4):
        parts.append(a[..., q * H:(q + 1) * H])
        parts.append(b[..., q * H:(q + 1) * H])
    return jnp.concatenate(parts, axis=-1)


def _pack_bidir(layer, H):
    """Build fused (input-weight, bias, recurrent-weight) for one layer."""
    f, b = layer["fwd"], layer["bwd"]
    zi = jnp.zeros_like(f["wih"])                          # (D, 4H)
    zh = jnp.zeros_like(f["whh"])                          # (H, 4H)
    # rows 0:D act on x[t]   (fwd half of each gate block),
    # rows D:2D act on x[T-1-t] (bwd half of each gate block)
    w_in = jnp.concatenate([_interleave_gates(f["wih"], zi, H),
                            _interleave_gates(zi, b["wih"], H)], axis=0)  # (2D, 8H)
    whh2 = jnp.concatenate([_interleave_gates(f["whh"], zh, H),
                            _interleave_gates(zh, b["whh"], H)], axis=0)  # (2H, 8H)
    b_in = _interleave_gates(f["b"], b["b"], H)                           # (1, 8H)
    return w_in, b_in, whh2


def bilstm_layer(x_tm, w_in, b_in, whh2, mask2):
    """Run one fused bidirectional layer over time-major x_tm (T,B,D) -> (T,B,2H)."""
    T, B, D = x_tm.shape
    H2 = whh2.shape[0]                                     # 2H
    # Combined per-row input [x_t ; x_{T-1-t}] so one projection matmul yields
    # fwd gates at t and bwd gates at T-1-t simultaneously.
    x2 = jnp.concatenate([x_tm, x_tm[::-1]], axis=-1).reshape(T * B, 2 * D)

    kernel = functools.partial(_bilstm_layer_kernel,
                               seq_len=T, batch=B, hidden=H2 // 2)
    # No grid: single kernel invocation, whole arrays resident in VMEM.
    return pl.pallas_call(
        kernel,
        out_shape=jax.ShapeDtypeStruct((T, B, H2), jnp.float32),
    )(x2, w_in, b_in, whh2, mask2)


# ---------------------------------------------------------------------------
# Parameters (deterministic init, same shapes as the PyTorch module)
# ---------------------------------------------------------------------------
def init_params(key, in_size=2, out_size=2, hidden_size=16, hidden_layer=2):
    H = hidden_size
    k_lstm = 1.0 / math.sqrt(H)
    layers = []
    for l in range(hidden_layer):
        d_in = in_size if l == 0 else 2 * H
        layer = {}
        for dname in ("fwd", "bwd"):
            key, k1, k2, k3, k4 = jax.random.split(key, 5)
            wih = jax.random.uniform(k1, (d_in, 4 * H), jnp.float32, -k_lstm, k_lstm)
            whh = jax.random.uniform(k2, (H, 4 * H), jnp.float32, -k_lstm, k_lstm)
            bih = jax.random.uniform(k3, (4 * H,), jnp.float32, -k_lstm, k_lstm)
            bhh = jax.random.uniform(k4, (4 * H,), jnp.float32, -k_lstm, k_lstm)
            layer[dname] = {"wih": wih, "whh": whh,
                            "b": (bih + bhh).reshape(1, 4 * H)}
        layers.append(layer)
    key, kw, kb = jax.random.split(key, 3)
    k_fc = 1.0 / math.sqrt(2 * H)
    fc_w = jax.random.uniform(kw, (2 * H, out_size), jnp.float32, -k_fc, k_fc)
    fc_b = jax.random.uniform(kb, (1, out_size), jnp.float32, -k_fc, k_fc)
    return {"lstm": layers, "fc_w": fc_w, "fc_b": fc_b, "hidden": H}


# ---------------------------------------------------------------------------
# Full forward pass (Blstm.forward equivalent)
# ---------------------------------------------------------------------------
def blstm_forward(params, src, src_lens):
    B, T, _ = src.shape
    H = params["hidden"]
    lens = jnp.asarray(src_lens, jnp.int32)                # (B,)

    # Precompute validity masks once (replaces per-step length compares).
    t_idx = jnp.arange(T, dtype=jnp.int32)
    m_f = (t_idx[:, None] < lens[None, :]).astype(jnp.float32)            # (T,B) fwd @ t=s
    m_b = ((T - 1 - t_idx)[:, None] < lens[None, :]).astype(jnp.float32)  # (T,B) bwd @ t=T-1-s
    mask2 = jnp.concatenate(
        [jnp.broadcast_to(m_f[:, :, None], (T, B, H)),
         jnp.broadcast_to(m_b[:, :, None], (T, B, H))], axis=-1)          # (T,B,2H)

    x = jnp.transpose(src.astype(jnp.float32), (1, 0, 2))                 # (T,B,D)
    for layer in params["lstm"]:
        w_in, b_in, whh2 = _pack_bidir(layer, H)
        x = bilstm_layer(x, w_in, b_in, whh2, mask2)                      # (T,B,2H)

    # pad_packed_sequence(batch_first=True) pads only up to max(src_lens).
    t_max = int(max(int(v) for v in src_lens))
    y = jnp.transpose(x, (1, 0, 2))[:, :t_max, :]                         # (B,Tmax,2H)

    # Final Linear in plain XLA (perf review: out_size=2 -> 2-lane output; a
    # dedicated Pallas call would cost more than the matmul itself).
    return y @ params["fc_w"] + params["fc_b"]


# ---------------------------------------------------------------------------
# Pure-JAX reference (same math, per-direction) for a correctness check
# ---------------------------------------------------------------------------
def blstm_reference(params, src, src_lens):
    B, T, _ = src.shape
    H = params["hidden"]
    lens = jnp.asarray(src_lens, jnp.int32)
    x = src.astype(jnp.float32)                               # (B, T, D)
    for layer in params["lstm"]:
        outs = []
        for rev, p in ((False, layer["fwd"]), (True, layer["bwd"])):
            h = jnp.zeros((B, H), jnp.float32)
            c = jnp.zeros((B, H), jnp.float32)
            out = jnp.zeros((T, B, H), jnp.float32)
            order = range(T - 1, -1, -1) if rev else range(T)
            for tt in order:
                gates = x[:, tt, :] @ p["wih"] + h @ p["whh"] + p["b"]
                i_g = jax.nn.sigmoid(gates[:, :H])
                f_g = jax.nn.sigmoid(gates[:, H:2 * H])
                g_g = jnp.tanh(gates[:, 2 * H:3 * H])
                o_g = jax.nn.sigmoid(gates[:, 3 * H:])
                c_n = f_g * c + i_g * g_g
                h_n = o_g * jnp.tanh(c_n)
                mask = (lens > tt).astype(jnp.float32)[:, None]
                h = h_n * mask
                c = c_n * mask
                out = out.at[tt].set(h)
            outs.append(jnp.transpose(out, (1, 0, 2)))
        x = jnp.concatenate(outs, axis=-1)
    t_max = int(max(int(v) for v in src_lens))
    y = x[:, :t_max, :]
    return y @ params["fc_w"] + params["fc_b"]


# ---------------------------------------------------------------------------
if __name__ == "__main__":
    key = jax.random.PRNGKey(0)
    key, k_src = jax.random.split(key)

    B, T, IN, OUT, H, L = 2, 8, 2, 2, 16, 2
    src = jax.random.normal(k_src, (B, T, IN), jnp.float32)
    src_lens = [8, 5]                      # variable lengths (enforce_sorted=False)

    params = init_params(key, in_size=IN, out_size=OUT,
                         hidden_size=H, hidden_layer=L)

    out = blstm_forward(params, src, src_lens)
    out = jax.block_until_ready(out)

    ref = blstm_reference(params, src, src_lens)
    assert out.shape == (B, max(src_lens), OUT), out.shape
    assert jnp.allclose(out, ref, atol=1e-4, rtol=1e-4), \
        float(jnp.max(jnp.abs(out - ref)))

    print("KERNEL_OK")
</pallas_src>

<mosaic_0001>
module attributes {stable_mosaic.version = 11 : i64} {
  func.func @_bilstm_layer_kernel(%arg0: memref<16x4xf32, #tpu.memory_space<vmem>>, %arg1: memref<4x128xf32, #tpu.memory_space<vmem>>, %arg2: memref<1x128xf32, #tpu.memory_space<vmem>>, %arg3: memref<32x128xf32, #tpu.memory_space<vmem>>, %arg4: memref<8x2x32xf32, #tpu.memory_space<vmem>>, %arg5: memref<8x2x32xf32, #tpu.memory_space<vmem>>) attributes {dimension_semantics = [], scalar_prefetch = 0 : i64, scratch_operands = 0 : i64, tpu.core_type = #tpu.core_type<tc>} {
    %c0 = arith.constant 0 : index
    %c0_0 = arith.constant 0 : index
    %0 = vector.load %arg0[%c0, %c0_0] : memref<16x4xf32, #tpu.memory_space<vmem>>, vector<16x4xf32>
    %c0_1 = arith.constant 0 : index
    %c0_2 = arith.constant 0 : index
    %1 = vector.load %arg1[%c0_1, %c0_2] : memref<4x128xf32, #tpu.memory_space<vmem>>, vector<4x128xf32>
    %cst = arith.constant dense<0.000000e+00> : vector<16x128xf32>
    %2 = tpu.matmul %0, %1, %cst {dimension_numbers = #tpu.dot_dimension_numbers<[1], [0], [0], [1], [0, 0, 1, 1], [], []>} : vector<16x4xf32>, vector<4x128xf32>, vector<16x128xf32> -> vector<16x128xf32>
    %c0_3 = arith.constant 0 : index
    %c0_4 = arith.constant 0 : index
    %3 = vector.load %arg2[%c0_3, %c0_4] : memref<1x128xf32, #tpu.memory_space<vmem>>, vector<1x128xf32>
    %4 = vector.broadcast %3 : vector<1x128xf32> to vector<16x128xf32>
    %5 = arith.addf %2, %4 : vector<16x128xf32>
    %c0_5 = arith.constant 0 : index
    %c0_6 = arith.constant 0 : index
    %6 = vector.load %arg3[%c0_5, %c0_6] : memref<32x128xf32, #tpu.memory_space<vmem>>, vector<32x128xf32>
    %c0_7 = arith.constant 0 : index
    %c0_8 = arith.constant 0 : index
    %c0_9 = arith.constant 0 : index
    %7 = vector.load %arg4[%c0_7, %c0_8, %c0_9] : memref<8x2x32xf32, #tpu.memory_space<vmem>>, vector<8x2x32xf32>
    %cst_10 = arith.constant 0.000000e+00 : f32
    %8 = vector.broadcast %cst_10 : f32 to vector<2x32xf32>
    %cst_11 = arith.constant 0.000000e+00 : f32
    %9 = vector.broadcast %cst_11 : f32 to vector<2x32xf32>
    %10 = vector.extract_strided_slice %5 {offsets = [0, 0], sizes = [2, 128], strides = [1, 1]} : vector<16x128xf32> to vector<2x128xf32>
    %cst_12 = arith.constant dense<0.000000e+00> : vector<2x128xf32>
    %11 = tpu.matmul %8, %6, %cst_12 {dimension_numbers = #tpu.dot_dimension_numbers<[1], [0], [0], [1], [0, 0, 1, 1], [], []>} : vector<2x32xf32>, vector<32x128xf32>, vector<2x128xf32> -> vector<2x128xf32>
    %12 = arith.addf %10, %11 : vector<2x128xf32>
    %13 = vector.extract_strided_slice %12 {offsets = [0, 0], sizes = [2, 32], strides = [1, 1]} : vector<2x128xf32> to vector<2x32xf32>
    %14 = arith.negf %13 : vector<2x32xf32>
    %15 = math.exp %14 : vector<2x32xf32>
    %cst_13 = arith.constant 1.000000e+00 : f32
    %16 = vector.broadcast %cst_13 : f32 to vector<2x32xf32>
    %17 = arith.addf %16, %15 : vector<2x32xf32>
    %18 = arith.divf %16, %17 : vector<2x32xf32>
    %19 = vector.extract_strided_slice %12 {offsets = [0, 32], sizes = [2, 32], strides = [1, 1]} : vector<2x128xf32> to vector<2x32xf32>
    %20 = arith.negf %19 : vector<2x32xf32>
    %21 = math.exp %20 : vector<2x32xf32>
    %cst_14 = arith.constant 1.000000e+00 : f32
    %22 = vector.broadcast %cst_14 : f32 to vector<2x32xf32>
    %23 = arith.addf %22, %21 : vector<2x32xf32>
    %24 = arith.divf %22, %23 : vector<2x32xf32>
    %25 = vector.extract_strided_slice %12 {offsets = [0, 64], sizes = [2, 32], strides = [1, 1]} : vector<2x128xf32> to vector<2x32xf32>
    %26 = math.tanh %25 : vector<2x32xf32>
    %27 = vector.extract_strided_slice %12 {offsets = [0, 96], sizes = [2, 32], strides = [1, 1]} : vector<2x128xf32> to vector<2x32xf32>
    %28 = arith.negf %27 : vector<2x32xf32>
    %29 = math.exp %28 : vector<2x32xf32>
    %cst_15 = arith.constant 1.000000e+00 : f32
    %30 = vector.broadcast %cst_15 : f32 to vector<2x32xf32>
    %31 = arith.addf %30, %29 : vector<2x32xf32>
    %32 = arith.divf %30, %31 : vector<2x32xf32>
    %33 = arith.mulf %24, %9 : vector<2x32xf32>
    %34 = arith.mulf %18, %26 : vector<2x32xf32>
    %35 = arith.addf %33, %34 : vector<2x32xf32>
    %36 = math.tanh %35 : vector<2x32xf32>
    %37 = arith.mulf %32, %36 : vector<2x32xf32>
    %38 = vector.extract_strided_slice %7 {offsets = [0, 0, 0], sizes = [1, 2, 32], strides = [1, 1, 1]} : vector<8x2x32xf32> to vector<1x2x32xf32>
    %39 = vector.shape_cast %38 : vector<1x2x32xf32> to vector<2x32xf32>
    %40 = arith.mulf %37, %39 : vector<2x32xf32>
    %41 = arith.mulf %35, %39 : vector<2x32xf32>
    %42 = vector.extract_strided_slice %40 {offsets = [0, 0], sizes = [2, 16], strides = [1, 1]} : vector<2x32xf32> to vector<2x16xf32>
    %c0_16 = arith.constant 0 : index
    %c0_17 = arith.constant 0 : index
    %c0_18 = arith.constant 0 : index
    %43 = vector.load %arg5[%c0_16, %c0_17, %c0_18] : memref<8x2x32xf32, #tpu.memory_space<vmem>>, vector<1x2x16xf32>
    %44 = vector.shape_cast %43 : vector<1x2x16xf32> to vector<2x16xf32>
    %45 = vector.shape_cast %42 : vector<2x16xf32> to vector<1x2x16xf32>
    tpu.vector_store %arg5[%c0_16, %c0_17, %c0_18], %45 {strides = array<i32>} : memref<8x2x32xf32, #tpu.memory_space<vmem>>, vector<1x2x16xf32>,
    %46 = vector.extract_strided_slice %40 {offsets = [0, 16], sizes = [2, 16], strides = [1, 1]} : vector<2x32xf32> to vector<2x16xf32>
    %c7 = arith.constant 7 : index
    %c0_19 = arith.constant 0 : index
    %c16 = arith.constant 16 : index
    %47 = vector.load %arg5[%c7, %c0_19, %c16] : memref<8x2x32xf32, #tpu.memory_space<vmem>>, vector<1x2x16xf32>
    %48 = vector.shape_cast %47 : vector<1x2x16xf32> to vector<2x16xf32>
    %49 = vector.shape_cast %46 : vector<2x16xf32> to vector<1x2x16xf32>
    tpu.vector_store %arg5[%c7, %c0_19, %c16], %49 {strides = array<i32>} : memref<8x2x32xf32, #tpu.memory_space<vmem>>, vector<1x2x16xf32>,
    %50 = vector.extract_strided_slice %5 {offsets = [2, 0], sizes = [2, 128], strides = [1, 1]} : vector<16x128xf32> to vector<2x128xf32>
    %cst_20 = arith.constant dense<0.000000e+00> : vector<2x128xf32>
    %51 = tpu.matmul %40, %6, %cst_20 {dimension_numbers = #tpu.dot_dimension_numbers<[1], [0], [0], [1], [0, 0, 1, 1], [], []>} : vector<2x32xf32>, vector<32x128xf32>, vector<2x128xf32> -> vector<2x128xf32>
    %52 = arith.addf %50, %51 : vector<2x128xf32>
    %53 = vector.extract_strided_slice %52 {offsets = [0, 0], sizes = [2, 32], strides = [1, 1]} : vector<2x128xf32> to vector<2x32xf32>
    %54 = arith.negf %53 : vector<2x32xf32>
    %55 = math.exp %54 : vector<2x32xf32>
    %cst_21 = arith.constant 1.000000e+00 : f32
    %56 = vector.broadcast %cst_21 : f32 to vector<2x32xf32>
    %57 = arith.addf %56, %55 : vector<2x32xf32>
    %58 = arith.divf %56, %57 : vector<2x32xf32>
    %59 = vector.extract_strided_slice %52 {offsets = [0, 32], sizes = [2, 32], strides = [1, 1]} : vector<2x128xf32> to vector<2x32xf32>
    %60 = arith.negf %59 : vector<2x32xf32>
    %61 = math.exp %60 : vector<2x32xf32>
    %cst_22 = arith.constant 1.000000e+00 : f32
    %62 = vector.broadcast %cst_22 : f32 to vector<2x32xf32>
    %63 = arith.addf %62, %61 : vector<2x32xf32>
    %64 = arith.divf %62, %63 : vector<2x32xf32>
    %65 = vector.extract_strided_slice %52 {offsets = [0, 64], sizes = [2, 32], strides = [1, 1]} : vector<2x128xf32> to vector<2x32xf32>
    %66 = math.tanh %65 : vector<2x32xf32>
    %67 = vector.extract_strided_slice %52 {offsets = [0, 96], sizes = [2, 32], strides = [1, 1]} : vector<2x128xf32> to vector<2x32xf32>
    %68 = arith.negf %67 : vector<2x32xf32>
    %69 = math.exp %68 : vector<2x32xf32>
    %cst_23 = arith.constant 1.000000e+00 : f32
    %70 = vector.broadcast %cst_23 : f32 to vector<2x32xf32>
    %71 = arith.addf %70, %69 : vector<2x32xf32>
    %72 = arith.divf %70, %71 : vector<2x32xf32>
    %73 = arith.mulf %64, %41 : vector<2x32xf32>
    %74 = arith.mulf %58, %66 : vector<2x32xf32>
    %75 = arith.addf %73, %74 : vector<2x32xf32>
    %76 = math.tanh %75 : vector<2x32xf32>
    %77 = arith.mulf %72, %76 : vector<2x32xf32>
    %78 = vector.extract_strided_slice %7 {offsets = [1, 0, 0], sizes = [1, 2, 32], strides = [1, 1, 1]} : vector<8x2x32xf32> to vector<1x2x32xf32>
    %79 = vector.shape_cast %78 : vector<1x2x32xf32> to vector<2x32xf32>
    %80 = arith.mulf %77, %79 : vector<2x32xf32>
    %81 = arith.mulf %75, %79 : vector<2x32xf32>
    %82 = vector.extract_strided_slice %80 {offsets = [0, 0], sizes = [2, 16], strides = [1, 1]} : vector<2x32xf32> to vector<2x16xf32>
    %c1 = arith.constant 1 : index
    %c0_24 = arith.constant 0 : index
    %c0_25 = arith.constant 0 : index
    %83 = vector.load %arg5[%c1, %c0_24, %c0_25] : memref<8x2x32xf32, #tpu.memory_space<vmem>>, vector<1x2x16xf32>
    %84 = vector.shape_cast %83 : vector<1x2x16xf32> to vector<2x16xf32>
    %85 = vector.shape_cast %82 : vector<2x16xf32> to vector<1x2x16xf32>
    tpu.vector_store %arg5[%c1, %c0_24, %c0_25], %85 {strides = array<i32>} : memref<8x2x32xf32, #tpu.memory_space<vmem>>, vector<1x2x16xf32>,
    %86 = vector.extract_strided_slice %80 {offsets = [0, 16], sizes = [2, 16], strides = [1, 1]} : vector<2x32xf32> to vector<2x16xf32>
    %c6 = arith.constant 6 : index
    %c0_26 = arith.constant 0 : index
    %c16_27 = arith.constant 16 : index
    %87 = vector.load %arg5[%c6, %c0_26, %c16_27] : memref<8x2x32xf32, #tpu.memory_space<vmem>>, vector<1x2x16xf32>
    %88 = vector.shape_cast %87 : vector<1x2x16xf32> to vector<2x16xf32>
    %89 = vector.shape_cast %86 : vector<2x16xf32> to vector<1x2x16xf32>
    tpu.vector_store %arg5[%c6, %c0_26, %c16_27], %89 {strides = array<i32>} : memref<8x2x32xf32, #tpu.memory_space<vmem>>, vector<1x2x16xf32>,
    %90 = vector.extract_strided_slice %5 {offsets = [4, 0], sizes = [2, 128], strides = [1, 1]} : vector<16x128xf32> to vector<2x128xf32>
    %cst_28 = arith.constant dense<0.000000e+00> : vector<2x128xf32>
    %91 = tpu.matmul %80, %6, %cst_28 {dimension_numbers = #tpu.dot_dimension_numbers<[1], [0], [0], [1], [0, 0, 1, 1], [], []>} : vector<2x32xf32>, vector<32x128xf32>, vector<2x128xf32> -> vector<2x128xf32>
    %92 = arith.addf %90, %91 : vector<2x128xf32>
    %93 = vector.extract_strided_slice %92 {offsets = [0, 0], sizes = [2, 32], strides = [1, 1]} : vector<2x128xf32> to vector<2x32xf32>
    %94 = arith.negf %93 : vector<2x32xf32>
    %95 = math.exp %94 : vector<2x32xf32>
    %cst_29 = arith.constant 1.000000e+00 : f32
    %96 = vector.broadcast %cst_29 : f32 to vector<2x32xf32>
    %97 = arith.addf %96, %95 : vector<2x32xf32>
    %98 = arith.divf %96, %97 : vector<2x32xf32>
    %99 = vector.extract_strided_slice %92 {offsets = [0, 32], sizes = [2, 32], strides = [1, 1]} : vector<2x128xf32> to vector<2x32xf32>
    %100 = arith.negf %99 : vector<2x32xf32>
    %101 = math.exp %100 : vector<2x32xf32>
    %cst_30 = arith.constant 1.000000e+00 : f32
    %102 = vector.broadcast %cst_30 : f32 to vector<2x32xf32>
    %103 = arith.addf %102, %101 : vector<2x32xf32>
    %104 = arith.divf %102, %103 : vector<2x32xf32>
    %105 = vector.extract_strided_slice %92 {offsets = [0, 64], sizes = [2, 32], strides = [1, 1]} : vector<2x128xf32> to vector<2x32xf32>
    %106 = math.tanh %105 : vector<2x32xf32>
    %107 = vector.extract_strided_slice %92 {offsets = [0, 96], sizes = [2, 32], strides = [1, 1]} : vector<2x128xf32> to vector<2x32xf32>
    %108 = arith.negf %107 : vector<2x32xf32>
    %109 = math.exp %108 : vector<2x32xf32>
    %cst_31 = arith.constant 1.000000e+00 : f32
    %110 = vector.broadcast %cst_31 : f32 to vector<2x32xf32>
    %111 = arith.addf %110, %109 : vector<2x32xf32>
    %112 = arith.divf %110, %111 : vector<2x32xf32>
    %113 = arith.mulf %104, %81 : vector<2x32xf32>
    %114 = arith.mulf %98, %106 : vector<2x32xf32>
    %115 = arith.addf %113, %114 : vector<2x32xf32>
    %116 = math.tanh %115 : vector<2x32xf32>
    %117 = arith.mulf %112, %116 : vector<2x32xf32>
    %118 = vector.extract_strided_slice %7 {offsets = [2, 0, 0], sizes = [1, 2, 32], strides = [1, 1, 1]} : vector<8x2x32xf32> to vector<1x2x32xf32>
    %119 = vector.shape_cast %118 : vector<1x2x32xf32> to vector<2x32xf32>
    %120 = arith.mulf %117, %119 : vector<2x32xf32>
    %121 = arith.mulf %115, %119 : vector<2x32xf32>
    %122 = vector.extract_strided_slice %120 {offsets = [0, 0], sizes = [2, 16], strides = [1, 1]} : vector<2x32xf32> to vector<2x16xf32>
    %c2 = arith.constant 2 : index
    %c0_32 = arith.constant 0 : index
    %c0_33 = arith.constant 0 : index
    %123 = vector.load %arg5[%c2, %c0_32, %c0_33] : memref<8x2x32xf32, #tpu.memory_space<vmem>>, vector<1x2x16xf32>
    %124 = vector.shape_cast %123 : vector<1x2x16xf32> to vector<2x16xf32>
    %125 = vector.shape_cast %122 : vector<2x16xf32> to vector<1x2x16xf32>
    tpu.vector_store %arg5[%c2, %c0_32, %c0_33], %125 {strides = array<i32>} : memref<8x2x32xf32, #tpu.memory_space<vmem>>, vector<1x2x16xf32>,
    %126 = vector.extract_strided_slice %120 {offsets = [0, 16], sizes = [2, 16], strides = [1, 1]} : vector<2x32xf32> to vector<2x16xf32>
    %c5 = arith.constant 5 : index
    %c0_34 = arith.constant 0 : index
    %c16_35 = arith.constant 16 : index
    %127 = vector.load %arg5[%c5, %c0_34, %c16_35] : memref<8x2x32xf32, #tpu.memory_space<vmem>>, vector<1x2x16xf32>
    %128 = vector.shape_cast %127 : vector<1x2x16xf32> to vector<2x16xf32>
    %129 = vector.shape_cast %126 : vector<2x16xf32> to vector<1x2x16xf32>
    tpu.vector_store %arg5[%c5, %c0_34, %c16_35], %129 {strides = array<i32>} : memref<8x2x32xf32, #tpu.memory_space<vmem>>, vector<1x2x16xf32>,
    %130 = vector.extract_strided_slice %5 {offsets = [6, 0], sizes = [2, 128], strides = [1, 1]} : vector<16x128xf32> to vector<2x128xf32>
    %cst_36 = arith.constant dense<0.000000e+00> : vector<2x128xf32>
    %131 = tpu.matmul %120, %6, %cst_36 {dimension_numbers = #tpu.dot_dimension_numbers<[1], [0], [0], [1], [0, 0, 1, 1], [], []>} : vector<2x32xf32>, vector<32x128xf32>, vector<2x128xf32> -> vector<2x128xf32>
    %132 = arith.addf %130, %131 : vector<2x128xf32>
    %133 = vector.extract_strided_slice %132 {offsets = [0, 0], sizes = [2, 32], strides = [1, 1]} : vector<2x128xf32> to vector<2x32xf32>
    %134 = arith.negf %133 : vector<2x32xf32>
    %135 = math.exp %134 : vector<2x32xf32>
    %cst_37 = arith.constant 1.000000e+00 : f32
    %136 = vector.broadcast %cst_37 : f32 to vector<2x32xf32>
    %137 = arith.addf %136, %135 : vector<2x32xf32>
    %138 = arith.divf %136, %137 : vector<2x32xf32>
    %139 = vector.extract_strided_slice %132 {offsets = [0, 32], sizes = [2, 32], strides = [1, 1]} : vector<2x128xf32> to vector<2x32xf32>
    %140 = arith.negf %139 : vector<2x32xf32>
    %141 = math.exp %140 : vector<2x32xf32>
    %cst_38 = arith.constant 1.000000e+00 : f32
    %142 = vector.broadcast %cst_38 : f32 to vector<2x32xf32>
    %143 = arith.addf %142, %141 : vector<2x32xf32>
    %144 = arith.divf %142, %143 : vector<2x32xf32>
    %145 = vector.extract_strided_slice %132 {offsets = [0, 64], sizes = [2, 32], strides = [1, 1]} : vector<2x128xf32> to vector<2x32xf32>
    %146 = math.tanh %145 : vector<2x32xf32>
    %147 = vector.extract_strided_slice %132 {offsets = [0, 96], sizes = [2, 32], strides = [1, 1]} : vector<2x128xf32> to vector<2x32xf32>
    %148 = arith.negf %147 : vector<2x32xf32>
    %149 = math.exp %148 : vector<2x32xf32>
    %cst_39 = arith.constant 1.000000e+00 : f32
    %150 = vector.broadcast %cst_39 : f32 to vector<2x32xf32>
    %151 = arith.addf %150, %149 : vector<2x32xf32>
    %152 = arith.divf %150, %151 : vector<2x32xf32>
    %153 = arith.mulf %144, %121 : vector<2x32xf32>
    %154 = arith.mulf %138, %146 : vector<2x32xf32>
    %155 = arith.addf %153, %154 : vector<2x32xf32>
    %156 = math.tanh %155 : vector<2x32xf32>
    %157 = arith.mulf %152, %156 : vector<2x32xf32>
    %158 = vector.extract_strided_slice %7 {offsets = [3, 0, 0], sizes = [1, 2, 32], strides = [1, 1, 1]} : vector<8x2x32xf32> to vector<1x2x32xf32>
    %159 = vector.shape_cast %158 : vector<1x2x32xf32> to vector<2x32xf32>
    %160 = arith.mulf %157, %159 : vector<2x32xf32>
    %161 = arith.mulf %155, %159 : vector<2x32xf32>
    %162 = vector.extract_strided_slice %160 {offsets = [0, 0], sizes = [2, 16], strides = [1, 1]} : vector<2x32xf32> to vector<2x16xf32>
    %c3 = arith.constant 3 : index
    %c0_40 = arith.constant 0 : index
    %c0_41 = arith.constant 0 : index
    %163 = vector.load %arg5[%c3, %c0_40, %c0_41] : memref<8x2x32xf32, #tpu.memory_space<vmem>>, vector<1x2x16xf32>
    %164 = vector.shape_cast %163 : vector<1x2x16xf32> to vector<2x16xf32>
    %165 = vector.shape_cast %162 : vector<2x16xf32> to vector<1x2x16xf32>
    tpu.vector_store %arg5[%c3, %c0_40, %c0_41], %165 {strides = array<i32>} : memref<8x2x32xf32, #tpu.memory_space<vmem>>, vector<1x2x16xf32>,
    %166 = vector.extract_strided_slice %160 {offsets = [0, 16], sizes = [2, 16], strides = [1, 1]} : vector<2x32xf32> to vector<2x16xf32>
    %c4 = arith.constant 4 : index
    %c0_42 = arith.constant 0 : index
    %c16_43 = arith.constant 16 : index
    %167 = vector.load %arg5[%c4, %c0_42, %c16_43] : memref<8x2x32xf32, #tpu.memory_space<vmem>>, vector<1x2x16xf32>
    %168 = vector.shape_cast %167 : vector<1x2x16xf32> to vector<2x16xf32>
    %169 = vector.shape_cast %166 : vector<2x16xf32> to vector<1x2x16xf32>
    tpu.vector_store %arg5[%c4, %c0_42, %c16_43], %169 {strides = array<i32>} : memref<8x2x32xf32, #tpu.memory_space<vmem>>, vector<1x2x16xf32>,
    %170 = vector.extract_strided_slice %5 {offsets = [8, 0], sizes = [2, 128], strides = [1, 1]} : vector<16x128xf32> to vector<2x128xf32>
    %cst_44 = arith.constant dense<0.000000e+00> : vector<2x128xf32>
    %171 = tpu.matmul %160, %6, %cst_44 {dimension_numbers = #tpu.dot_dimension_numbers<[1], [0], [0], [1], [0, 0, 1, 1], [], []>} : vector<2x32xf32>, vector<32x128xf32>, vector<2x128xf32> -> vector<2x128xf32>
    %172 = arith.addf %170, %171 : vector<2x128xf32>
    %173 = vector.extract_strided_slice %172 {offsets = [0, 0], sizes = [2, 32], strides = [1, 1]} : vector<2x128xf32> to vector<2x32xf32>
    %174 = arith.negf %173 : vector<2x32xf32>
    %175 = math.exp %174 : vector<2x32xf32>
    %cst_45 = arith.constant 1.000000e+00 : f32
    %176 = vector.broadcast %cst_45 : f32 to vector<2x32xf32>
    %177 = arith.addf %176, %175 : vector<2x32xf32>
    %178 = arith.divf %176, %177 : vector<2x32xf32>
    %179 = vector.extract_strided_slice %172 {offsets = [0, 32], sizes = [2, 32], strides = [1, 1]} : vector<2x128xf32> to vector<2x32xf32>
    %180 = arith.negf %179 : vector<2x32xf32>
    %181 = math.exp %180 : vector<2x32xf32>
    %cst_46 = arith.constant 1.000000e+00 : f32
    %182 = vector.broadcast %cst_46 : f32 to vector<2x32xf32>
    %183 = arith.addf %182, %181 : vector<2x32xf32>
    %184 = arith.divf %182, %183 : vector<2x32xf32>
    %185 = vector.extract_strided_slice %172 {offsets = [0, 64], sizes = [2, 32], strides = [1, 1]} : vector<2x128xf32> to vector<2x32xf32>
    %186 = math.tanh %185 : vector<2x32xf32>
    %187 = vector.extract_strided_slice %172 {offsets = [0, 96], sizes = [2, 32], strides = [1, 1]} : vector<2x128xf32> to vector<2x32xf32>
    %188 = arith.negf %187 : vector<2x32xf32>
    %189 = math.exp %188 : vector<2x32xf32>
    %cst_47 = arith.constant 1.000000e+00 : f32
    %190 = vector.broadcast %cst_47 : f32 to vector<2x32xf32>
    %191 = arith.addf %190, %189 : vector<2x32xf32>
    %192 = arith.divf %190, %191 : vector<2x32xf32>
    %193 = arith.mulf %184, %161 : vector<2x32xf32>
    %194 = arith.mulf %178, %186 : vector<2x32xf32>
    %195 = arith.addf %193, %194 : vector<2x32xf32>
    %196 = math.tanh %195 : vector<2x32xf32>
    %197 = arith.mulf %192, %196 : vector<2x32xf32>
    %198 = vector.extract_strided_slice %7 {offsets = [4, 0, 0], sizes = [1, 2, 32], strides = [1, 1, 1]} : vector<8x2x32xf32> to vector<1x2x32xf32>
    %199 = vector.shape_cast %198 : vector<1x2x32xf32> to vector<2x32xf32>
    %200 = arith.mulf %197, %199 : vector<2x32xf32>
    %201 = arith.mulf %195, %199 : vector<2x32xf32>
    %202 = vector.extract_strided_slice %200 {offsets = [0, 0], sizes = [2, 16], strides = [1, 1]} : vector<2x32xf32> to vector<2x16xf32>
    %c4_48 = arith.constant 4 : index
    %c0_49 = arith.constant 0 : index
    %c0_50 = arith.constant 0 : index
    %203 = vector.load %arg5[%c4_48, %c0_49, %c0_50] : memref<8x2x32xf32, #tpu.memory_space<vmem>>, vector<1x2x16xf32>
    %204 = vector.shape_cast %203 : vector<1x2x16xf32> to vector<2x16xf32>
    %205 = vector.shape_cast %202 : vector<2x16xf32> to vector<1x2x16xf32>
    tpu.vector_store %arg5[%c4_48, %c0_49, %c0_50], %205 {strides = array<i32>} : memref<8x2x32xf32, #tpu.memory_space<vmem>>, vector<1x2x16xf32>,
    %206 = vector.extract_strided_slice %200 {offsets = [0, 16], sizes = [2, 16], strides = [1, 1]} : vector<2x32xf32> to vector<2x16xf32>
    %c3_51 = arith.constant 3 : index
    %c0_52 = arith.constant 0 : index
    %c16_53 = arith.constant 16 : index
    %207 = vector.load %arg5[%c3_51, %c0_52, %c16_53] : memref<8x2x32xf32, #tpu.memory_space<vmem>>, vector<1x2x16xf32>
    %208 = vector.shape_cast %207 : vector<1x2x16xf32> to vector<2x16xf32>
    %209 = vector.shape_cast %206 : vector<2x16xf32> to vector<1x2x16xf32>
    tpu.vector_store %arg5[%c3_51, %c0_52, %c16_53], %209 {strides = array<i32>} : memref<8x2x32xf32, #tpu.memory_space<vmem>>, vector<1x2x16xf32>,
    %210 = vector.extract_strided_slice %5 {offsets = [10, 0], sizes = [2, 128], strides = [1, 1]} : vector<16x128xf32> to vector<2x128xf32>
    %cst_54 = arith.constant dense<0.000000e+00> : vector<2x128xf32>
    %211 = tpu.matmul %200, %6, %cst_54 {dimension_numbers = #tpu.dot_dimension_numbers<[1], [0], [0], [1], [0, 0, 1, 1], [], []>} : vector<2x32xf32>, vector<32x128xf32>, vector<2x128xf32> -> vector<2x128xf32>
    %212 = arith.addf %210, %211 : vector<2x128xf32>
    %213 = vector.extract_strided_slice %212 {offsets = [0, 0], sizes = [2, 32], strides = [1, 1]} : vector<2x128xf32> to vector<2x32xf32>
    %214 = arith.negf %213 : vector<2x32xf32>
    %215 = math.exp %214 : vector<2x32xf32>
    %cst_55 = arith.constant 1.000000e+00 : f32
    %216 = vector.broadcast %cst_55 : f32 to vector<2x32xf32>
    %217 = arith.addf %216, %215 : vector<2x32xf32>
    %218 = arith.divf %216, %217 : vector<2x32xf32>
    %219 = vector.extract_strided_slice %212 {offsets = [0, 32], sizes = [2, 32], strides = [1, 1]} : vector<2x128xf32> to vector<2x32xf32>
    %220 = arith.negf %219 : vector<2x32xf32>
    %221 = math.exp %220 : vector<2x32xf32>
    %cst_56 = arith.constant 1.000000e+00 : f32
    %222 = vector.broadcast %cst_56 : f32 to vector<2x32xf32>
    %223 = arith.addf %222, %221 : vector<2x32xf32>
    %224 = arith.divf %222, %223 : vector<2x32xf32>
    %225 = vector.extract_strided_slice %212 {offsets = [0, 64], sizes = [2, 32], strides = [1, 1]} : vector<2x128xf32> to vector<2x32xf32>
    %226 = math.tanh %225 : vector<2x32xf32>
    %227 = vector.extract_strided_slice %212 {offsets = [0, 96], sizes = [2, 32], strides = [1, 1]} : vector<2x128xf32> to vector<2x32xf32>
    %228 = arith.negf %227 : vector<2x32xf32>
    %229 = math.exp %228 : vector<2x32xf32>
    %cst_57 = arith.constant 1.000000e+00 : f32
    %230 = vector.broadcast %cst_57 : f32 to vector<2x32xf32>
    %231 = arith.addf %230, %229 : vector<2x32xf32>
    %232 = arith.divf %230, %231 : vector<2x32xf32>
    %233 = arith.mulf %224, %201 : vector<2x32xf32>
    %234 = arith.mulf %218, %226 : vector<2x32xf32>
    %235 = arith.addf %233, %234 : vector<2x32xf32>
    %236 = math.tanh %235 : vector<2x32xf32>
    %237 = arith.mulf %232, %236 : vector<2x32xf32>
    %238 = vector.extract_strided_slice %7 {offsets = [5, 0, 0], sizes = [1, 2, 32], strides = [1, 1, 1]} : vector<8x2x32xf32> to vector<1x2x32xf32>
    %239 = vector.shape_cast %238 : vector<1x2x32xf32> to vector<2x32xf32>
    %240 = arith.mulf %237, %239 : vector<2x32xf32>
    %241 = arith.mulf %235, %239 : vector<2x32xf32>
    %242 = vector.extract_strided_slice %240 {offsets = [0, 0], sizes = [2, 16], strides = [1, 1]} : vector<2x32xf32> to vector<2x16xf32>
    %c5_58 = arith.constant 5 : index
    %c0_59 = arith.constant 0 : index
    %c0_60 = arith.constant 0 : index
    %243 = vector.load %arg5[%c5_58, %c0_59, %c0_60] : memref<8x2x32xf32, #tpu.memory_space<vmem>>, vector<1x2x16xf32>
    %244 = vector.shape_cast %243 : vector<1x2x16xf32> to vector<2x16xf32>
    %245 = vector.shape_cast %242 : vector<2x16xf32> to vector<1x2x16xf32>
    tpu.vector_store %arg5[%c5_58, %c0_59, %c0_60], %245 {strides = array<i32>} : memref<8x2x32xf32, #tpu.memory_space<vmem>>, vector<1x2x16xf32>,
    %246 = vector.extract_strided_slice %240 {offsets = [0, 16], sizes = [2, 16], strides = [1, 1]} : vector<2x32xf32> to vector<2x16xf32>
    %c2_61 = arith.constant 2 : index
    %c0_62 = arith.constant 0 : index
    %c16_63 = arith.constant 16 : index
    %247 = vector.load %arg5[%c2_61, %c0_62, %c16_63] : memref<8x2x32xf32, #tpu.memory_space<vmem>>, vector<1x2x16xf32>
    %248 = vector.shape_cast %247 : vector<1x2x16xf32> to vector<2x16xf32>
    %249 = vector.shape_cast %246 : vector<2x16xf32> to vector<1x2x16xf32>
    tpu.vector_store %arg5[%c2_61, %c0_62, %c16_63], %249 {strides = array<i32>} : memref<8x2x32xf32, #tpu.memory_space<vmem>>, vector<1x2x16xf32>,
    %250 = vector.extract_strided_slice %5 {offsets = [12, 0], sizes = [2, 128], strides = [1, 1]} : vector<16x128xf32> to vector<2x128xf32>
    %cst_64 = arith.constant dense<0.000000e+00> : vector<2x128xf32>
    %251 = tpu.matmul %240, %6, %cst_64 {dimension_numbers = #tpu.dot_dimension_numbers<[1], [0], [0], [1], [0, 0, 1, 1], [], []>} : vector<2x32xf32>, vector<32x128xf32>, vector<2x128xf32> -> vector<2x128xf32>
    %252 = arith.addf %250, %251 : vector<2x128xf32>
    %253 = vector.extract_strided_slice %252 {offsets = [0, 0], sizes = [2, 32], strides = [1, 1]} : vector<2x128xf32> to vector<2x32xf32>
    %254 = arith.negf %253 : vector<2x32xf32>
    %255 = math.exp %254 : vector<2x32xf32>
    %cst_65 = arith.constant 1.000000e+00 : f32
    %256 = vector.broadcast %cst_65 : f32 to vector<2x32xf32>
    %257 = arith.addf %256, %255 : vector<2x32xf32>
    %258 = arith.divf %256, %257 : vector<2x32xf32>
    %259 = vector.extract_strided_slice %252 {offsets = [0, 32], sizes = [2, 32], strides = [1, 1]} : vector<2x128xf32> to vector<2x32xf32>
    %260 = arith.negf %259 : vector<2x32xf32>
    %261 = math.exp %260 : vector<2x32xf32>
    %cst_66 = arith.constant 1.000000e+00 : f32
    %262 = vector.broadcast %cst_66 : f32 to vector<2x32xf32>
    %263 = arith.addf %262, %261 : vector<2x32xf32>
    %264 = arith.divf %262, %263 : vector<2x32xf32>
    %265 = vector.extract_strided_slice %252 {offsets = [0, 64], sizes = [2, 32], strides = [1, 1]} : vector<2x128xf32> to vector<2x32xf32>
    %266 = math.tanh %265 : vector<2x32xf32>
    %267 = vector.extract_strided_slice %252 {offsets = [0, 96], sizes = [2, 32], strides = [1, 1]} : vector<2x128xf32> to vector<2x32xf32>
    %268 = arith.negf %267 : vector<2x32xf32>
    %269 = math.exp %268 : vector<2x32xf32>
    %cst_67 = arith.constant 1.000000e+00 : f32
    %270 = vector.broadcast %cst_67 : f32 to vector<2x32xf32>
    %271 = arith.addf %270, %269 : vector<2x32xf32>
    %272 = arith.divf %270, %271 : vector<2x32xf32>
    %273 = arith.mulf %264, %241 : vector<2x32xf32>
    %274 = arith.mulf %258, %266 : vector<2x32xf32>
    %275 = arith.addf %273, %274 : vector<2x32xf32>
    %276 = math.tanh %275 : vector<2x32xf32>
    %277 = arith.mulf %272, %276 : vector<2x32xf32>
    %278 = vector.extract_strided_slice %7 {offsets = [6, 0, 0], sizes = [1, 2, 32], strides = [1, 1, 1]} : vector<8x2x32xf32> to vector<1x2x32xf32>
    %279 = vector.shape_cast %278 : vector<1x2x32xf32> to vector<2x32xf32>
    %280 = arith.mulf %277, %279 : vector<2x32xf32>
    %281 = arith.mulf %275, %279 : vector<2x32xf32>
    %282 = vector.extract_strided_slice %280 {offsets = [0, 0], sizes = [2, 16], strides = [1, 1]} : vector<2x32xf32> to vector<2x16xf32>
    %c6_68 = arith.constant 6 : index
    %c0_69 = arith.constant 0 : index
    %c0_70 = arith.constant 0 : index
    %283 = vector.load %arg5[%c6_68, %c0_69, %c0_70] : memref<8x2x32xf32, #tpu.memory_space<vmem>>, vector<1x2x16xf32>
    %284 = vector.shape_cast %283 : vector<1x2x16xf32> to vector<2x16xf32>
    %285 = vector.shape_cast %282 : vector<2x16xf32> to vector<1x2x16xf32>
    tpu.vector_store %arg5[%c6_68, %c0_69, %c0_70], %285 {strides = array<i32>} : memref<8x2x32xf32, #tpu.memory_space<vmem>>, vector<1x2x16xf32>,
    %286 = vector.extract_strided_slice %280 {offsets = [0, 16], sizes = [2, 16], strides = [1, 1]} : vector<2x32xf32> to vector<2x16xf32>
    %c1_71 = arith.constant 1 : index
    %c0_72 = arith.constant 0 : index
    %c16_73 = arith.constant 16 : index
    %287 = vector.load %arg5[%c1_71, %c0_72, %c16_73] : memref<8x2x32xf32, #tpu.memory_space<vmem>>, vector<1x2x16xf32>
    %288 = vector.shape_cast %287 : vector<1x2x16xf32> to vector<2x16xf32>
    %289 = vector.shape_cast %286 : vector<2x16xf32> to vector<1x2x16xf32>
    tpu.vector_store %arg5[%c1_71, %c0_72, %c16_73], %289 {strides = array<i32>} : memref<8x2x32xf32, #tpu.memory_space<vmem>>, vector<1x2x16xf32>,
    %290 = vector.extract_strided_slice %5 {offsets = [14, 0], sizes = [2, 128], strides = [1, 1]} : vector<16x128xf32> to vector<2x128xf32>
    %cst_74 = arith.constant dense<0.000000e+00> : vector<2x128xf32>
    %291 = tpu.matmul %280, %6, %cst_74 {dimension_numbers = #tpu.dot_dimension_numbers<[1], [0], [0], [1], [0, 0, 1, 1], [], []>} : vector<2x32xf32>, vector<32x128xf32>, vector<2x128xf32> -> vector<2x128xf32>
    %292 = arith.addf %290, %291 : vector<2x128xf32>
    %293 = vector.extract_strided_slice %292 {offsets = [0, 0], sizes = [2, 32], strides = [1, 1]} : vector<2x128xf32> to vector<2x32xf32>
    %294 = arith.negf %293 : vector<2x32xf32>
    %295 = math.exp %294 : vector<2x32xf32>
    %cst_75 = arith.constant 1.000000e+00 : f32
    %296 = vector.broadcast %cst_75 : f32 to vector<2x32xf32>
    %297 = arith.addf %296, %295 : vector<2x32xf32>
    %298 = arith.divf %296, %297 : vector<2x32xf32>
    %299 = vector.extract_strided_slice %292 {offsets = [0, 32], sizes = [2, 32], strides = [1, 1]} : vector<2x128xf32> to vector<2x32xf32>
    %300 = arith.negf %299 : vector<2x32xf32>
    %301 = math.exp %300 : vector<2x32xf32>
    %cst_76 = arith.constant 1.000000e+00 : f32
    %302 = vector.broadcast %cst_76 : f32 to vector<2x32xf32>
    %303 = arith.addf %302, %301 : vector<2x32xf32>
    %304 = arith.divf %302, %303 : vector<2x32xf32>
    %305 = vector.extract_strided_slice %292 {offsets = [0, 64], sizes = [2, 32], strides = [1, 1]} : vector<2x128xf32> to vector<2x32xf32>
    %306 = math.tanh %305 : vector<2x32xf32>
    %307 = vector.extract_strided_slice %292 {offsets = [0, 96], sizes = [2, 32], strides = [1, 1]} : vector<2x128xf32> to vector<2x32xf32>
    %308 = arith.negf %307 : vector<2x32xf32>
    %309 = math.exp %308 : vector<2x32xf32>
    %cst_77 = arith.constant 1.000000e+00 : f32
    %310 = vector.broadcast %cst_77 : f32 to vector<2x32xf32>
    %311 = arith.addf %310, %309 : vector<2x32xf32>
    %312 = arith.divf %310, %311 : vector<2x32xf32>
    %313 = arith.mulf %304, %281 : vector<2x32xf32>
    %314 = arith.mulf %298, %306 : vector<2x32xf32>
    %315 = arith.addf %313, %314 : vector<2x32xf32>
    %316 = math.tanh %315 : vector<2x32xf32>
    %317 = arith.mulf %312, %316 : vector<2x32xf32>
    %318 = vector.extract_strided_slice %7 {offsets = [7, 0, 0], sizes = [1, 2, 32], strides = [1, 1, 1]} : vector<8x2x32xf32> to vector<1x2x32xf32>
    %319 = vector.shape_cast %318 : vector<1x2x32xf32> to vector<2x32xf32>
    %320 = arith.mulf %317, %319 : vector<2x32xf32>
    %321 = vector.extract_strided_slice %320 {offsets = [0, 0], sizes = [2, 16], strides = [1, 1]} : vector<2x32xf32> to vector<2x16xf32>
    %c7_78 = arith.constant 7 : index
    %c0_79 = arith.constant 0 : index
    %c0_80 = arith.constant 0 : index
    %322 = vector.load %arg5[%c7_78, %c0_79, %c0_80] : memref<8x2x32xf32, #tpu.memory_space<vmem>>, vector<1x2x16xf32>
    %323 = vector.shape_cast %322 : vector<1x2x16xf32> to vector<2x16xf32>
    %324 = vector.shape_cast %321 : vector<2x16xf32> to vector<1x2x16xf32>
    tpu.vector_store %arg5[%c7_78, %c0_79, %c0_80], %324 {strides = array<i32>} : memref<8x2x32xf32, #tpu.memory_space<vmem>>, vector<1x2x16xf32>,
    %325 = vector.extract_strided_slice %320 {offsets = [0, 16], sizes = [2, 16], strides = [1, 1]} : vector<2x32xf32> to vector<2x16xf32>
    %c0_81 = arith.constant 0 : index
    %c0_82 = arith.constant 0 : index
    %c16_83 = arith.constant 16 : index
    %326 = vector.load %arg5[%c0_81, %c0_82, %c16_83] : memref<8x2x32xf32, #tpu.memory_space<vmem>>, vector<1x2x16xf32>
    %327 = vector.shape_cast %326 : vector<1x2x16xf32> to vector<2x16xf32>
    %328 = vector.shape_cast %325 : vector<2x16xf32> to vector<1x2x16xf32>
    tpu.vector_store %arg5[%c0_81, %c0_82, %c16_83], %328 {strides = array<i32>} : memref<8x2x32xf32, #tpu.memory_space<vmem>>, vector<1x2x16xf32>,
    return
  }
}

</mosaic_0001>

<bundles_post_ra>
// kernel: tpu_custom_call.1
= control target key start
LH: loop header
LB: loop body
LE: loop exit
PB: predicated region body
PF: predicated region fallthrough
CT: control target
= control target key end

     0   :  { %10 = vsyncpa [#allocation3], 0  ;;  %s1707_s0 = inlined_call_operand.vmem [shape: f32[16,4], index: 0, kind: input, shape index: {}]   ;;  %s1708_s1 = inlined_call_operand.vmem [shape: f32[4,128], index: 1, kind: input, shape index: {}]   ;;  %s1709_s2 = inlined_call_operand.vmem [shape: f32[1,128], index: 2, kind: input, shape index: {}]   ;;  %s1710_s3 = inlined_call_operand.hbm [shape: f32[32,128], index: 3, kind: input, shape index: {}]   ;;  %s1711_s4 = inlined_call_operand.vmem [shape: f32[8,2,32], index: 4, kind: input, shape index: {}]   ;;  %s1712_s5 = inlined_call_operand.hbm [shape: f32[8,2,32], index: 5, kind: output, shape index: {}]  }
   0x1   :  { %11 = vsyncpa [#allocation4], 0  ;;  %s1455_s18 = smov [#allocation2]   ;;  %s1407_s22 = scalar_lea.hbm %s1710_s3, 512 }
   0x2   :  { %s23_s19 = sshll.u32 %s1455_s18, 4  ;;  %p1408_p0 = scmp.ne.s32.totalorder %s1710_s3, %s1407_s22  ;;  %s24_s19 = int_to_ptr.vmem [resolvable:$true] %s23_s19 }
   0x3   :  { %p1411_p1 = scmp.lt.u32.totalorder %s1407_s22, %s1710_s3 }
   0x5   :  { %p1413_p2 = pnand %p1411_p1, %p1408_p0 }
   0x7   :  { %1416 = shalt.err (!%p1413_p2)
}
   0x8   :  { %s1417_s27 = scalar_lea.vmem %s24_s19, 512  ;;  %p1422_p4 = scmp.lt.s32.totalorder %s24_s19, %s24_s19 }
   0x9   :  { %p1418_p3 = scmp.ne.s32.totalorder %s24_s19, %s1417_s27  ;;  %p1423_p5 = scmp.lt.s32.totalorder %s1417_s27, %s1417_s27 }
   0xb   :  { %p1424_p6 = por %p1423_p5, %p1422_p4 }
   0xd   :  { %p1425_p7 = pnand %p1424_p6, %p1418_p3 }
   0xf   :  { %1428 = shalt.err (!%p1425_p7)
}
  0x10   :  { %s1456_s28 = smov 128   ;;  %s1457_s29 = smov 8  }
  0x11   :  { %29 = dma.hbm_to_vmem [thread:$0]  %s1710_s3, 512, %s24_s19, [#allocation3], %s1456_s28, %s1456_s28, %s1457_s29  }
  0x12   :  { %1451 = dma.done.wait [#allocation3], 512  }
  0x13   :  { %1452 = vsyncadd [#allocation3], 4294966784  ;;  %v1458_v0 = vmov 0.0|0.0   ;;  %vm1459_vm0 = vmmov 0   ;;  %v1460_v1 = vmov 0.0   ;;  %vm52_vm1 = vcmask 1043456  }
  0x14   :  { %1284 = vmatprep.subr.bf16.mxu1 %v1458_v0  ;;  %1204 = vmatprep.mubr.msk.f32.mxu1 %vm1459_vm0, %v1460_v1  ;;  %vm45_vm2 = vcmask 31744   ;;  %v131_v2 = vld [vmem:[#allocation2] sm:$0xff]  ;;  %v132_v3 = vld [vmem:[#allocation2 + $0x8] sm:$0xff]  ;;  %v37_v4 = vld [vmem:[%s1708_s1] sm:$0xf]  ;;  %s1461_s12 = smov 64  }
  0x15   :  { %v1514_v5 = vpack.c.bf16 %v132_v3, %v131_v2  ;;  %1191 = vmatprep.subr.msk.mxu0 %vm52_vm1, %v37_v4  ;;  %v35_v6 = vld [vmem:[%s1707_s0] sm:$0xff]  ;;  %v36_v7 = vld [vmem:[%s1707_s0 + $0x8] sm:$0xff]  ;;  %s1463_s15 = smov 96   ;;  %vm255_vm3 = vcmask 123904   ;;  %vm258_vm4 = vcmask 255104   ;;  %vm143_vm5 = vcmask 261120  }
  0x16   :  { %v133_v8 = vld [vmem:[#allocation2 + $0x10] sm:$0xff]  ;;  %1192 = vmatpush3.msk.msra.mxu0 %vm52_vm1, %v37_v4  ;;  %1193 = vmatprep.mubr.msk.f32.mxu0 %vm45_vm2, %v35_v6  ;;  %v134_v9 = vld [vmem:[#allocation2 + $0x18] sm:$0xff]  ;;  %vm504_vm6 = vcmask 128004   ;;  %vm507_vm7 = vcmask 259204   ;;  %vm378_vm8 = vcmask 125954   ;;  %vm381_vm9 = vcmask 257154  }
  0x17   :  { %1286 = vmatpush3.bf16.msra.mxu1 %v1514_v5  ;;  %1194 = vmatmul.mubr.msk.f32.vlgmr.msra.gmra.mrb[0].mxu0 %vm45_vm2, %v36_v7  ;;  %v1523_v10 = vpack.c.bf16 %v134_v9, %v133_v8  ;;  %v1129_v11 = vld [vmem:[%s1709_s2] ss:$0 sm:$0xff]  ;;  %s1462_s2 = smov 32   ;;  %v136_v47 = vld [vmem:[%s1711_s4 + $0x2] sm:$0x3]  ;;  %vm630_vm10 = vcmask 130054  }
  0x18   :  { %1287 = vmatprep.subr.bf16.mxu1 %v1458_v0  ;;  %1290 = vmatprep.subr.bf16.mxu0 %v1458_v0  ;;  %v135_v30 = vld [vmem:[%s1711_s4] sm:$0x3]  ;;  %v364_v48 = vrot.slane %v136_v47, 6  ;;  %vm633_vm11 = vcmask 261254  }
  0x19   :  { %1292 = vmatpush3.bf16.msra.mxu0 %v1514_v5  ;;  %1215 = vmatprep.mubr.msk.f32.mxu0 %vm1459_vm0, %v1460_v1 }
  0x1a   :  { %1293 = vmatprep.subr.bf16.mxu0 %v1458_v0 }
  0x1b   :  { %1289 = vmatpush3.bf16.msra.mxu1 %v1523_v10 }
  0x1c   :  { %1296 = vmatprep.subr.bf16.mxu1 %v1458_v0 }
  0x1d   :  { %1295 = vmatpush3.bf16.msra.mxu0 %v1523_v10 }
  0x1e   :  { %1205 = vmatmul.mubr.f32.vlgmr.msra.gmra.mrb[0].mxu1 %v1460_v1  ;;  %1302 = vmatprep.subr.bf16.mxu0 %v1458_v0 }
  0x1f   :  { %1298 = vmatpush3.bf16.msra.mxu1 %v1514_v5  ;;  %1226 = vmatprep.mubr.msk.f32.mxu1 %vm1459_vm0, %v1460_v1 }
  0x20   :  { %1299 = vmatprep.subr.bf16.mxu1 %v1458_v0 }
  0x23   :  { %1301 = vmatpush3.bf16.msra.mxu1 %v1523_v10 }
  0x24   :  { %1308 = vmatprep.subr.bf16.mxu1 %v1458_v0 }
  0xea   :  { %v1195_v12 = vpop.f32.mrb[0].mxu0 }
  0xeb   :  { %v1545_v13 = vadd.f32 %v1195_v12, %v1129_v11  ;;  %v122_v14 = vpop.f32.mrb[1].mxu0 }
  0xec   :  { %v1547_v15 = vadd.f32 %v1129_v11, %v122_v14  ;;  %v137_v14 = vld [vmem:[%s1711_s4 + $0x4] sm:$0x3] }
  0xf1   :  { %v213_v16 = vpop.f32.mrb[0].mxu1 }
  0xf2   :  { %v217_v17 = vadd.f32 %v213_v16, %v1547_v15  ;;  %v1206_v18 = vpop.f32.mrb[1].mxu1  ;;  %v490_v16 = vrot.slane %v137_v14, 4 }
  0xf4   :  { %1343 = vtanh.f32 %v217_v17  ;;  %v1133_v20 = vmul.f32 -1.442695, %v217_v17 }
  0xf6   :  { %1345 = vpow2.f32 %v1133_v20 }
  0xfe   :  { %v1344_v19 = vpop.eup %1343 }
  0xff   :  { %227 = vrot.lane.b32.xlu0 %v1344_v19, %s1461_s12 }
 0x100   :  { %v1346_v21 = vpop.eup %1345 }
 0x101   :  { %v221_v22 = vadd.f32 1.0, %v1346_v21 }
 0x103   :  { %1347 = vrcp.f32 %v221_v22 }
 0x10d   :  { %v1348_v23 = vpop.eup %1347 }
 0x10e   :  { %v225_v26 = vmul.f32 0.0, %v1348_v23 }
 0x171   :  { %v228_v24 = vpop.permute.xlu0 %227 }
 0x172   :  { %v230_v25 = vmul.f32 %v1348_v23, %v228_v24 }
 0x174   :  { %232 = vrot.lane.b32.xlu0 %v230_v25, %s1462_s2 }
 0x1e6   :  { %v233_v27 = vpop.permute.xlu0 %232 }
 0x1e7   :  { %v235_v28 = vadd.f32 %v233_v27, %v225_v26 }
 0x1e9   :  { %1349 = vtanh.f32 %v235_v28 }
 0x1f3   :  { %v1350_v29 = vpop.eup %1349 }
 0x1f4   :  { %238 = vrot.lane.b32.xlu1 %v1350_v29, %s1461_s12 }
 0x1f8   :  { %243 = vrot.lane.b32.xlu1 %v135_v30, %s1463_s15 }
 0x266   :  { %v239_v31 = vpop.permute.xlu1 %238 }
 0x267   :  { %v241_v32 = vmul.f32 %v1348_v23, %v239_v31 }
 0x26a   :  { %v244_v33 = vpop.permute.xlu1 %243 }
 0x26b   :  { %v246_v34 = vmul.f32 %v244_v33, %v241_v32 }
 0x26d   :  { %252 = vrot.lane.b32.xlu0 %v246_v34, %s1462_s2 }
 0x271   :  { %247 = vrot.lane.b32.xlu0 %v135_v30, %s1462_s2 }
 0x2df   :  { %v253_v35 = vpop.permute.xlu0 %252 }
 0x2e0   :  { %256 = vst.msk [vmem:[#allocation5] sm:$0x3] %vm255_vm3, %v253_v35  ;;  %1216 = vmatmul.mubr.msk.f32.vlgmr.msra.gmra.mrb[2].mxu0 %vm143_vm5, %v253_v35 }
 0x2e1   :  { %259 = vst.msk [vmem:[#allocation5 + $0xe] sm:$0x3] %vm258_vm4, %v253_v35  ;;  %1304 = vmatpush3.bf16.msra.mxu0 %v1514_v5  ;;  %1237 = vmatprep.mubr.msk.f32.mxu0 %vm1459_vm0, %v1460_v1 }
 0x2e2   :  { %1305 = vmatprep.subr.bf16.mxu0 %v1458_v0 }
 0x2e3   :  { %v248_v49 = vpop.permute.xlu0 %247 }
 0x2e4   :  { %v250_v50 = vmul.f32 %v248_v49, %v235_v28 }
 0x2e5   :  { %1307 = vmatpush3.bf16.msra.mxu0 %v1523_v10 }
 0x2e6   :  { %1314 = vmatprep.subr.bf16.mxu0 %v1458_v0  ;;  %v344_v51 = vrot.slane %v250_v50, 6 }
 0x3b3   :  { %v328_v36 = vpop.f32.mrb[2].mxu0 }
 0x3b4   :  { %v333_v37 = vrot.slane %v328_v36, 6  ;;  %v1217_v38 = vpop.f32.mrb[3].mxu0 }
 0x3b6   :  { %v335_v39 = vadd.f32 %v333_v37, %v1547_v15 }
 0x3b8   :  { %1351 = vtanh.f32 %v335_v39  ;;  %v1135_v41 = vmul.f32 -1.442695, %v335_v39 }
 0x3ba   :  { %1353 = vpow2.f32 %v1135_v41  ;;  %v138_v41 = vld [vmem:[%s1711_s4 + $0x6] sm:$0x3] }
 0x3c2   :  { %v1352_v40 = vpop.eup %1351 }
 0x3c3   :  { %348 = vrot.lane.b32.xlu1 %v1352_v40, %s1461_s12 }
 0x3c4   :  { %v1354_v42 = vpop.eup %1353 }
 0x3c5   :  { %v339_v43 = vadd.f32 1.0, %v1354_v42  ;;  %v616_v42 = vrot.slane %v138_v41, 2 }
 0x3c7   :  { %1355 = vrcp.f32 %v339_v43 }
 0x3d1   :  { %v1356_v44 = vpop.eup %1355 }
 0x3d2   :  { %v346_v52 = vmul.f32 %v1356_v44, %v344_v51 }
 0x435   :  { %v349_v45 = vpop.permute.xlu1 %348 }
 0x436   :  { %v351_v46 = vmul.f32 %v1356_v44, %v349_v45 }
 0x438   :  { %353 = vrot.lane.b32.xlu1 %v351_v46, %s1462_s2 }
 0x43c   :  { %365 = vrot.lane.b32.xlu1 %v364_v48, %s1463_s15 }
 0x4aa   :  { %v354_v53 = vpop.permute.xlu1 %353 }
 0x4ab   :  { %v356_v54 = vadd.f32 %v354_v53, %v346_v52 }
 0x4ad   :  { %1357 = vtanh.f32 %v356_v54 }
 0x4ae   :  { %v366_v57 = vpop.permute.xlu1 %365 }
 0x4b7   :  { %v1358_v55 = vpop.eup %1357 }
 0x4b8   :  { %359 = vrot.lane.b32.xlu0 %v1358_v55, %s1461_s12 }
 0x52a   :  { %v360_v56 = vpop.permute.xlu0 %359 }
 0x52b   :  { %v362_v58 = vmul.f32 %v1356_v44, %v360_v56 }
 0x52d   :  { %v1576_v59 = vmul.f32 %v366_v57, %v362_v58 }
 0x52f   :  { %v383_v60 = vrot.slane %v1576_v59, 2 }
 0x531   :  { %384 = vrot.lane.b32.xlu0 %v383_v60, %s1462_s2 }
 0x535   :  { %369 = vrot.lane.b32.xlu0 %v364_v48, %s1462_s2 }
 0x5a3   :  { %v385_v61 = vpop.permute.xlu0 %384 }
 0x5a4   :  { %1227 = vmatmul.mubr.msk.f32.vlgmr.msra.gmra.mrb[2].mxu1 %vm143_vm5, %v385_v61 }
 0x5a5   :  { %1310 = vmatpush3.bf16.msra.mxu1 %v1514_v5  ;;  %1248 = vmatprep.mubr.msk.f32.mxu1 %vm1459_vm0, %v1460_v1 }
 0x5a6   :  { %1311 = vmatprep.subr.bf16.mxu1 %v1458_v0 }
 0x5a7   :  { %v370_v17 = vpop.permute.xlu0 %369 }
 0x5a8   :  { %v372_v18 = vmul.f32 %v370_v17, %v356_v54 }
 0x5a9   :  { %1313 = vmatpush3.bf16.msra.mxu1 %v1523_v10 }
 0x5aa   :  { %1320 = vmatprep.subr.bf16.mxu1 %v1458_v0  ;;  %v470_v19 = vrot.slane %v372_v18, 6 }
 0x677   :  { %v454_v62 = vpop.f32.mrb[2].mxu1 }
 0x678   :  { %v459_v63 = vrot.slane %v454_v62, 4  ;;  %v1228_v2 = vpop.f32.mrb[3].mxu1 }
 0x67a   :  { %v461_v3 = vadd.f32 %v459_v63, %v1547_v15 }
 0x67c   :  { %1359 = vtanh.f32 %v461_v3  ;;  %v1137_v6 = vmul.f32 -1.442695, %v461_v3 }
 0x67e   :  { %1361 = vpow2.f32 %v1137_v6 }
 0x686   :  { %v1360_v4 = vpop.eup %1359 }
 0x687   :  { %474 = vrot.lane.b32.xlu1 %v1360_v4, %s1461_s12  ;;  %v139_v4 = vld [vmem:[%s1711_s4 + $0x8] sm:$0x3] }
 0x688   :  { %v1362_v7 = vpop.eup %1361 }
 0x689   :  { %v465_v8 = vadd.f32 1.0, %v1362_v7 }
 0x68b   :  { %1363 = vrcp.f32 %v465_v8 }
 0x695   :  { %v1364_v9 = vpop.eup %1363 }
 0x696   :  { %v472_v20 = vmul.f32 %v1364_v9, %v470_v19 }
 0x6f9   :  { %v475_v11 = vpop.permute.xlu1 %474 }
 0x6fa   :  { %v477_v12 = vmul.f32 %v1364_v9, %v475_v11 }
 0x6fc   :  { %479 = vrot.lane.b32.xlu1 %v477_v12, %s1462_s2 }
 0x700   :  { %491 = vrot.lane.b32.xlu1 %v490_v16, %s1463_s15 }
 0x76e   :  { %v480_v21 = vpop.permute.xlu1 %479 }
 0x76f   :  { %v482_v22 = vadd.f32 %v480_v21, %v472_v20 }
 0x771   :  { %1365 = vtanh.f32 %v482_v22 }
 0x772   :  { %v492_v25 = vpop.permute.xlu1 %491 }
 0x77b   :  { %v1366_v23 = vpop.eup %1365 }
 0x77c   :  { %485 = vrot.lane.b32.xlu0 %v1366_v23, %s1461_s12 }
 0x7ee   :  { %v486_v24 = vpop.permute.xlu0 %485 }
 0x7ef   :  { %v488_v26 = vmul.f32 %v1364_v9, %v486_v24 }
 0x7f1   :  { %v1596_v27 = vmul.f32 %v492_v25, %v488_v26 }
 0x7f3   :  { %v509_v28 = vrot.slane %v1596_v27, 4 }
 0x7f5   :  { %510 = vrot.lane.b32.xlu0 %v509_v28, %s1462_s2 }
 0x7f9   :  { %495 = vrot.lane.b32.xlu0 %v490_v16, %s1462_s2 }
 0x867   :  { %v511_v29 = vpop.permute.xlu0 %510 }
 0x868   :  { %1238 = vmatmul.mubr.msk.f32.vlgmr.msra.gmra.mrb[4].mxu0 %vm143_vm5, %v511_v29 }
 0x869   :  { %1316 = vmatpush3.bf16.msra.mxu0 %v1514_v5  ;;  %1259 = vmatprep.mubr.msk.f32.mxu0 %vm1459_vm0, %v1460_v1 }
 0x86a   :  { %1317 = vmatprep.subr.bf16.mxu0 %v1458_v0 }
 0x86d   :  { %1319 = vmatpush3.bf16.msra.mxu0 %v1523_v10 }
 0x86e   :  { %1326 = vmatprep.subr.bf16.mxu0 %v1458_v0 }
 0x93b   :  { %v580_v30 = vpop.f32.mrb[4].mxu0 }
 0x93c   :  { %v585_v31 = vrot.slane %v580_v30, 2  ;;  %v1239_v32 = vpop.f32.mrb[5].mxu0 }
 0x93e   :  { %v587_v33 = vadd.f32 %v585_v31, %v1547_v15  ;;  %v496_v15 = vpop.permute.xlu0 %495 }
 0x93f   :  { %v498_v43 = vmul.f32 %v496_v15, %v482_v22 }
 0x940   :  { %1367 = vtanh.f32 %v587_v33  ;;  %v1139_v35 = vmul.f32 -1.442695, %v587_v33 }
 0x941   :  { %v596_v44 = vrot.slane %v498_v43, 6 }
 0x942   :  { %1369 = vpow2.f32 %v1139_v35 }
 0x94a   :  { %v1368_v34 = vpop.eup %1367 }
 0x94b   :  { %600 = vrot.lane.b32.xlu1 %v1368_v34, %s1461_s12 }
 0x94c   :  { %v1370_v36 = vpop.eup %1369 }
 0x94d   :  { %v591_v37 = vadd.f32 1.0, %v1370_v36 }
 0x94f   :  { %1371 = vrcp.f32 %v591_v37 }
 0x959   :  { %v1372_v38 = vpop.eup %1371 }
 0x95a   :  { %v598_v45 = vmul.f32 %v1372_v38, %v596_v44 }
 0x9bd   :  { %v601_v39 = vpop.permute.xlu1 %600 }
 0x9be   :  { %v603_v40 = vmul.f32 %v1372_v38, %v601_v39 }
 0x9c0   :  { %605 = vrot.lane.b32.xlu1 %v603_v40, %s1462_s2 }
 0x9c4   :  { %617 = vrot.lane.b32.xlu1 %v616_v42, %s1463_s15 }
 0xa32   :  { %v606_v46 = vpop.permute.xlu1 %605 }
 0xa33   :  { %v608_v47 = vadd.f32 %v606_v46, %v598_v45 }
 0xa35   :  { %1373 = vtanh.f32 %v608_v47 }
 0xa36   :  { %v618_v50 = vpop.permute.xlu1 %617 }
 0xa3f   :  { %v1374_v48 = vpop.eup %1373 }
 0xa40   :  { %611 = vrot.lane.b32.xlu0 %v1374_v48, %s1461_s12 }
 0xab2   :  { %v612_v49 = vpop.permute.xlu0 %611 }
 0xab3   :  { %v614_v51 = vmul.f32 %v1372_v38, %v612_v49 }
 0xab5   :  { %v1616_v52 = vmul.f32 %v618_v50, %v614_v51 }
 0xab7   :  { %v635_v53 = vrot.slane %v1616_v52, 6 }
 0xab9   :  { %636 = vrot.lane.b32.xlu0 %v635_v53, %s1462_s2 }
 0xabd   :  { %621 = vrot.lane.b32.xlu0 %v616_v42, %s1462_s2 }
 0xb2b   :  { %v637_v54 = vpop.permute.xlu0 %636 }
 0xb2c   :  { %1249 = vmatmul.mubr.msk.f32.vlgmr.msra.gmra.mrb[4].mxu1 %vm143_vm5, %v637_v54 }
 0xb2d   :  { %1322 = vmatpush3.bf16.msra.mxu1 %v1514_v5  ;;  %1270 = vmatprep.mubr.msk.f32.mxu1 %vm1459_vm0, %v1460_v1 }
 0xb2e   :  { %1323 = vmatprep.subr.bf16.mxu1 %v1458_v0 }
 0xb2f   :  { %v622_v6 = vpop.permute.xlu0 %621 }
 0xb30   :  { %v624_v7 = vmul.f32 %v622_v6, %v608_v47 }
 0xb31   :  { %1325 = vmatpush3.bf16.msra.mxu1 %v1523_v10 }
 0xb32   :  { %v719_v8 = vrot.slane %v624_v7, 6 }
 0xbff   :  { %v706_v55 = vpop.f32.mrb[4].mxu1 }
 0xc00   :  { %v710_v56 = vadd.f32 %v706_v55, %v1545_v13  ;;  %v1250_v57 = vpop.f32.mrb[5].mxu1  ;;  %v141_v55 = vld [vmem:[%s1711_s4 + $0xc] sm:$0x3] }
 0xc02   :  { %1375 = vtanh.f32 %v710_v56  ;;  %v1141_v60 = vmul.f32 -1.442695, %v710_v56  ;;  %v979_v56 = vrot.slane %v141_v55, 4 }
 0xc04   :  { %1377 = vpow2.f32 %v1141_v60 }
 0xc0c   :  { %v1376_v58 = vpop.eup %1375 }
 0xc0d   :  { %723 = vrot.lane.b32.xlu1 %v1376_v58, %s1461_s12 }
 0xc0e   :  { %v1378_v61 = vpop.eup %1377 }
 0xc0f   :  { %v714_v62 = vadd.f32 1.0, %v1378_v61 }
 0xc11   :  { %1379 = vrcp.f32 %v714_v62 }
 0xc1b   :  { %v1380_v63 = vpop.eup %1379 }
 0xc1c   :  { %v721_v9 = vmul.f32 %v1380_v63, %v719_v8 }
 0xc7f   :  { %v724_v2 = vpop.permute.xlu1 %723 }
 0xc80   :  { %v726_v3 = vmul.f32 %v1380_v63, %v724_v2 }
 0xc82   :  { %728 = vrot.lane.b32.xlu1 %v726_v3, %s1462_s2 }
 0xc86   :  { %739 = vrot.lane.b32.xlu1 %v139_v4, %s1463_s15 }
 0xcf4   :  { %v729_v11 = vpop.permute.xlu1 %728 }
 0xcf5   :  { %v731_v12 = vadd.f32 %v729_v11, %v721_v9 }
 0xcf7   :  { %1381 = vtanh.f32 %v731_v12 }
 0xcf8   :  { %v740_v17 = vpop.permute.xlu1 %739 }
 0xd01   :  { %v1382_v14 = vpop.eup %1381 }
 0xd02   :  { %734 = vrot.lane.b32.xlu0 %v1382_v14, %s1461_s12 }
 0xd74   :  { %v735_v16 = vpop.permute.xlu0 %734 }
 0xd75   :  { %v737_v18 = vmul.f32 %v1380_v63, %v735_v16 }
 0xd77   :  { %v742_v19 = vmul.f32 %v740_v17, %v737_v18 }
 0xd79   :  { %748 = vrot.lane.b32.xlu0 %v742_v19, %s1462_s2 }
 0xd7d   :  { %743 = vrot.lane.b32.xlu0 %v139_v4, %s1462_s2 }
 0xdeb   :  { %v1637_v20 = vpop.permute.xlu0 %748 }
 0xdec   :  { %1260 = vmatmul.mubr.msk.f32.vlgmr.msra.gmra.mrb[6].mxu0 %vm143_vm5, %v1637_v20 }
 0xded   :  { %1328 = vmatpush3.bf16.msra.mxu0 %v1514_v5  ;;  %1281 = vmatprep.mubr.msk.f32.mxu0 %vm1459_vm0, %v1460_v1 }
 0xdee   :  { %1329 = vmatprep.subr.bf16.mxu0 %v1458_v0  ;;  %v140_v0 = vld [vmem:[%s1711_s4 + $0xa] sm:$0x3] }
 0xdef   :  { %v744_v31 = vpop.permute.xlu0 %743 }
 0xdf0   :  { %v746_v32 = vmul.f32 %v744_v31, %v731_v12 }
 0xdf1   :  { %1331 = vmatpush3.bf16.msra.mxu0 %v1523_v10  ;;  %v857_v10 = vrot.slane %v140_v0, 6 }
 0xdf2   :  { %v837_v33 = vrot.slane %v746_v32, 6 }
 0xebf   :  { %v821_v21 = vpop.f32.mrb[6].mxu0 }
 0xec0   :  { %v826_v22 = vrot.slane %v821_v21, 6  ;;  %v1261_v23 = vpop.f32.mrb[7].mxu0 }
 0xec2   :  { %v828_v24 = vadd.f32 %v826_v22, %v1545_v13 }
 0xec4   :  { %1383 = vtanh.f32 %v828_v24  ;;  %v1143_v26 = vmul.f32 -1.442695, %v828_v24  ;;  %v142_v24 = vld [vmem:[%s1711_s4 + $0xe] sm:$0x3]  ;;  %s1464_s4 = smov [#allocation5]  }
 0xec5   :  { %s1117_s30 = sshll.u32 %s1464_s4, 4  ;;  %s1118_s30 = int_to_ptr.vmem [resolvable:$true] %s1117_s30 }
 0xec6   :  { %1385 = vpow2.f32 %v1143_v26  ;;  %v1101_v26 = vrot.slane %v142_v24, 2  ;;  %s1429_s6 = scalar_lea.vmem %s1118_s30, 256  ;;  %p1434_p9 = scmp.lt.s32.totalorder %s1118_s30, %s1118_s30 }
 0xec7   :  { %p1430_p8 = scmp.ne.s32.totalorder %s1118_s30, %s1429_s6  ;;  %p1435_p10 = scmp.lt.s32.totalorder %s1429_s6, %s1429_s6 }
 0xec9   :  { %p1436_p11 = por %p1435_p10, %p1434_p9 }
 0xecb   :  { %p1437_p12 = pnand %p1436_p11, %p1430_p8 }
 0xece   :  { %v1384_v25 = vpop.eup %1383 }
 0xecf   :  { %841 = vrot.lane.b32.xlu1 %v1384_v25, %s1461_s12 }
 0xed0   :  { %v1386_v28 = vpop.eup %1385 }
 0xed1   :  { %v832_v5 = vadd.f32 1.0, %v1386_v28 }
 0xed3   :  { %1387 = vrcp.f32 %v832_v5 }
 0xedd   :  { %v1388_v29 = vpop.eup %1387 }
 0xede   :  { %v839_v34 = vmul.f32 %v1388_v29, %v837_v33 }
 0xf41   :  { %v842_v1 = vpop.permute.xlu1 %841 }
 0xf42   :  { %v844_v30 = vmul.f32 %v1388_v29, %v842_v1 }
 0xf44   :  { %846 = vrot.lane.b32.xlu1 %v844_v30, %s1462_s2 }
 0xf48   :  { %858 = vrot.lane.b32.xlu1 %v857_v10, %s1463_s15 }
 0xfb6   :  { %v847_v35 = vpop.permute.xlu1 %846 }
 0xfb7   :  { %v849_v36 = vadd.f32 %v847_v35, %v839_v34 }
 0xfb9   :  { %1389 = vtanh.f32 %v849_v36 }
 0xfba   :  { %v859_v39 = vpop.permute.xlu1 %858 }
 0xfc3   :  { %v1390_v37 = vpop.eup %1389 }
 0xfc4   :  { %852 = vrot.lane.b32.xlu0 %v1390_v37, %s1461_s12 }
0x1036   :  { %v853_v38 = vpop.permute.xlu0 %852 }
0x1037   :  { %v855_v40 = vmul.f32 %v1388_v29, %v853_v38 }
0x1039   :  { %v861_v41 = vmul.f32 %v859_v39, %v855_v40 }
0x103b   :  { %v872_v42 = vrot.slane %v861_v41, 2 }
0x103d   :  { %873 = vrot.lane.b32.xlu0 %v872_v42, %s1462_s2 }
0x1041   :  { %862 = vrot.lane.b32.xlu0 %v857_v10, %s1462_s2 }
0x10af   :  { %v874_v15 = vpop.permute.xlu0 %873 }
0x10b0   :  { %1271 = vmatmul.mubr.msk.f32.vlgmr.msra.gmra.mrb[6].mxu1 %vm143_vm5, %v874_v15 }
0x10b3   :  { %v863_v57 = vpop.permute.xlu0 %862 }
0x10b4   :  { %v865_v58 = vmul.f32 %v863_v57, %v849_v36 }
0x10b6   :  { %v959_v60 = vrot.slane %v865_v58, 6 }
0x1183   :  { %v943_v43 = vpop.f32.mrb[6].mxu1 }
0x1184   :  { %v948_v44 = vrot.slane %v943_v43, 4  ;;  %v1272_v45 = vpop.f32.mrb[7].mxu1 }
0x1186   :  { %v950_v46 = vadd.f32 %v948_v44, %v1545_v13 }
0x1188   :  { %1391 = vtanh.f32 %v950_v46  ;;  %v1145_v48 = vmul.f32 -1.442695, %v950_v46 }
0x118a   :  { %1393 = vpow2.f32 %v1145_v48 }
0x1192   :  { %v1392_v47 = vpop.eup %1391 }
0x1193   :  { %963 = vrot.lane.b32.xlu1 %v1392_v47, %s1461_s12 }
0x1194   :  { %v1394_v49 = vpop.eup %1393 }
0x1195   :  { %v954_v50 = vadd.f32 1.0, %v1394_v49 }
0x1197   :  { %1395 = vrcp.f32 %v954_v50 }
0x11a1   :  { %v1396_v51 = vpop.eup %1395 }
0x11a2   :  { %v961_v61 = vmul.f32 %v1396_v51, %v959_v60 }
0x1205   :  { %v964_v53 = vpop.permute.xlu1 %963 }
0x1206   :  { %v966_v54 = vmul.f32 %v1396_v51, %v964_v53 }
0x1208   :  { %968 = vrot.lane.b32.xlu1 %v966_v54, %s1462_s2 }
0x120c   :  { %980 = vrot.lane.b32.xlu1 %v979_v56, %s1463_s15 }
0x127a   :  { %v969_v62 = vpop.permute.xlu1 %968 }
0x127b   :  { %v971_v63 = vadd.f32 %v969_v62, %v961_v61 }
0x127d   :  { %1397 = vtanh.f32 %v971_v63 }
0x127e   :  { %v981_v4 = vpop.permute.xlu1 %980 }
0x1287   :  { %v1398_v2 = vpop.eup %1397 }
0x1288   :  { %974 = vrot.lane.b32.xlu0 %v1398_v2, %s1461_s12 }
0x12fa   :  { %v975_v3 = vpop.permute.xlu0 %974 }
0x12fb   :  { %v977_v6 = vmul.f32 %v1396_v51, %v975_v3 }
0x12fd   :  { %v983_v7 = vmul.f32 %v981_v4, %v977_v6 }
0x12ff   :  { %v994_v8 = vrot.slane %v983_v7, 4 }
0x1301   :  { %995 = vrot.lane.b32.xlu0 %v994_v8, %s1462_s2 }
0x1305   :  { %984 = vrot.lane.b32.xlu0 %v979_v56, %s1462_s2 }
0x1373   :  { %v996_v9 = vpop.permute.xlu0 %995 }
0x1374   :  { %1282 = vmatmul.mubr.msk.f32.vlgmr.msra.gmra.mrb[8].mxu0 %vm143_vm5, %v996_v9 }
0x1447   :  { %v1065_v11 = vpop.f32.mrb[8].mxu0 }
0x1448   :  { %v1070_v12 = vrot.slane %v1065_v11, 2  ;;  %v1283_v14 = vpop.f32.mrb[9].mxu0 }
0x144a   :  { %v1072_v16 = vadd.f32 %v1070_v12, %v1545_v13  ;;  %v985_v13 = vpop.permute.xlu0 %984 }
0x144b   :  { %v987_v28 = vmul.f32 %v985_v13, %v971_v63 }
0x144c   :  { %1399 = vtanh.f32 %v1072_v16  ;;  %v1147_v18 = vmul.f32 -1.442695, %v1072_v16 }
0x144d   :  { %v1081_v5 = vrot.slane %v987_v28, 6 }
0x144e   :  { %1401 = vpow2.f32 %v1147_v18 }
0x1456   :  { %v1400_v17 = vpop.eup %1399 }
0x1457   :  { %1085 = vrot.lane.b32.xlu1 %v1400_v17, %s1461_s12 }
0x1458   :  { %v1402_v19 = vpop.eup %1401 }
0x1459   :  { %v1076_v21 = vadd.f32 1.0, %v1402_v19 }
0x145b   :  { %1403 = vrcp.f32 %v1076_v21 }
0x1465   :  { %v1404_v22 = vpop.eup %1403 }
0x1466   :  { %v1083_v29 = vmul.f32 %v1404_v22, %v1081_v5 }
0x14c9   :  { %v1086_v23 = vpop.permute.xlu1 %1085 }
0x14ca   :  { %v1088_v25 = vmul.f32 %v1404_v22, %v1086_v23 }
0x14cc   :  { %1090 = vrot.lane.b32.xlu1 %v1088_v25, %s1462_s2 }
0x14d0   :  { %1102 = vrot.lane.b32.xlu1 %v1101_v26, %s1463_s15 }
0x14d4   :  { %500 = vrot.lane.b32.xlu1 %v1596_v27, %s1462_s2 }
0x14d8   :  { %867 = vrot.lane.b32.xlu1 %v861_v41, %s1462_s2 }
0x153e   :  { %v1091_v1 = vpop.permute.xlu1 %1090 }
0x153f   :  { %v1093_v30 = vadd.f32 %v1091_v1, %v1083_v29 }
0x1541   :  { %1405 = vtanh.f32 %v1093_v30 }
0x1542   :  { %v1103_v0 = vpop.permute.xlu1 %1102 }
0x1546   :  { %v501_v10 = vpop.permute.xlu1 %500 }
0x1547   :  { %505 = vst.msk [vmem:[#allocation5] sm:$0x30] %vm504_vm6, %v501_v10 }
0x1548   :  { %508 = vst.msk [vmem:[#allocation5 + $0x6] sm:$0x30] %vm507_vm7, %v501_v10 }
0x154a   :  { %v868_v27 = vpop.permute.xlu1 %867 }
0x154b   :  { %v1406_v31 = vpop.eup %1405  ;;  %870 = vst.msk [vmem:[#allocation5 + $0x8] sm:$0xc] %vm378_vm8, %v868_v27 }
0x154c   :  { %871 = vst.msk [vmem:[#allocation5 + $0x2] sm:$0xc] %vm381_vm9, %v868_v27  ;;  %1096 = vrot.lane.b32.xlu0 %v1406_v31, %s1461_s12 }
0x1550   :  { %374 = vrot.lane.b32.xlu0 %v1576_v59, %s1462_s2 }
0x1554   :  { %626 = vrot.lane.b32.xlu0 %v1616_v52, %s1462_s2 }
0x1558   :  { %989 = vrot.lane.b32.xlu0 %v983_v7, %s1462_s2 }
0x15be   :  { %v1097_v32 = vpop.permute.xlu0 %1096 }
0x15bf   :  { %v1099_v33 = vmul.f32 %v1404_v22, %v1097_v32 }
0x15c1   :  { %v1105_v34 = vmul.f32 %v1103_v0, %v1099_v33 }
0x15c2   :  { %v375_v35 = vpop.permute.xlu0 %374 }
0x15c3   :  { %379 = vst.msk [vmem:[#allocation5] sm:$0xc] %vm378_vm8, %v375_v35  ;;  %1107 = vrot.lane.b32.xlu1 %v1105_v34, %s1462_s2 }
0x15c4   :  { %382 = vst.msk [vmem:[#allocation5 + $0xa] sm:$0xc] %vm381_vm9, %v375_v35 }
0x15c6   :  { %v627_v36 = vpop.permute.xlu0 %626 }
0x15c7   :  { %631 = vst.msk [vmem:[#allocation5] sm:$0xc0] %vm630_vm10, %v627_v36 }
0x15c8   :  { %634 = vst.msk [vmem:[#allocation5 + $0x2] sm:$0xc0] %vm633_vm11, %v627_v36 }
0x15c9   :  { %751 = vst.msk [vmem:[#allocation5 + $0x8] sm:$0x3] %vm255_vm3, %v1637_v20 }
0x15ca   :  { %752 = vst.msk [vmem:[#allocation5 + $0x6] sm:$0x3] %vm258_vm4, %v1637_v20  ;;  %v990_v59 = vpop.permute.xlu0 %989 }
0x15cb   :  { %992 = vst.msk [vmem:[#allocation5 + $0x8] sm:$0x30] %vm504_vm6, %v990_v59 }
0x15cc   :  { %993 = vst.msk [vmem:[#allocation5 - $0x2] sm:$0x30] %vm507_vm7, %v990_v59 }
0x1635   :  { %v1108_v52 = vpop.permute.xlu1 %1107 }
0x1636   :  { %1110 = vst.msk [vmem:[#allocation5 + $0x8] sm:$0xc0] %vm630_vm10, %v1108_v52 }
0x1637   :  { %1111 = vst.msk [vmem:[#allocation5 - $0x6] sm:$0xc0] %vm633_vm11, %v1108_v52 }
0x1638   :  { %1440 = shalt.err (!%p1437_p12)
}
0x1639   :  { %s1441_s3 = scalar_lea.hbm %s1712_s5, 256 }
0x163a   :  { %p1442_p13 = scmp.ne.s32.totalorder %s1712_s5, %s1441_s3  ;;  %p1445_p0 = scmp.lt.u32.totalorder %s1441_s3, %s1712_s5 }
0x163c   :  { %p1447_p1 = pnand %p1445_p0, %p1442_p13 }
0x163e   :  { %1450 = shalt.err (!%p1447_p1)
}
0x163f   :  { %s1465_s1 = smov 2  }
0x1640   :  { %1123 = dma.vmem_to_hbm [thread:$0]  %s1118_s30, 256, %s1712_s5, [#allocation4], %s1462_s2, %s1462_s2, %s1465_s1  }
0x1641   :  { %1453 = dma.done.wait [#allocation4], 256  }
0x1642   :  { %1454 = vsyncadd [#allocation4], 4294967040 }
0x1643   :  { %1127 = vsyncpa [#allocation3], 1 }
0x1644   :  { %1128 = vsyncpa [#allocation4], 1 }

</bundles_post_ra>
